<compile_context>
chip_gen: v7x
topology: tpu7x:2x2x1
jax: 0.10.0
libtpu: 0.0.40
codegen_flags: <defaults>
</compile_context>

<pallas_src>
import functools

import jax
import jax.numpy as jnp
from jax import lax
from jax.experimental import pallas as pl
from jax.experimental.pallas import tpu as pltpu


def _gru_encoder_kernel(tok_ref,                 # VMEM (S, 1)  int32 token ids
                        emb_ref,                 # VMEM (V, H)  bf16 embedding table
                        w_ih_ref,                # VMEM (H, 3H) bf16  input->gates  [r|z|n]
                        w_hh_ref,                # VMEM (H, 3H) bf16  hidden->gates [r|z|n]
                        b_ih_ref,                # VMEM (1, 3H) f32
                        b_hh_ref,                # VMEM (1, 3H) f32
                        h0_ref,                  # VMEM (1, H)  f32
                        out_ref,                 # VMEM (S, H)  f32
                        *, hidden_size, n_layers, seq_len, vocab_size):
    H = hidden_size
    S = seq_len
    V = vocab_size

    w_ih = w_ih_ref[...]
    w_hh = w_hh_ref[...]
    b_ih = b_ih_ref[...]
    b_hh = b_hh_ref[...]

    # 1) Embedding gather for the whole sequence as a single one-hot MXU matmul.
    #    The one-hot rows select exact bf16 table rows, so this equals a row gather.
    tok = tok_ref[...]                                               # (S, 1) int32
    onehot = (tok == lax.broadcasted_iota(jnp.int32, (S, V), 1)).astype(emb_ref.dtype)
    x_seq = jnp.dot(onehot, emb_ref[...],
                    preferred_element_type=jnp.float32)              # (S, H) f32

    # 2) Precompute input-side gate projections for all tokens at once (batched, M=S).
    gi_seq = jnp.dot(x_seq.astype(w_ih.dtype), w_ih,
                     preferred_element_type=jnp.float32) + b_ih      # (S, 3H) f32

    def gru_cell(gi, h):
        # gi: (1, 3H) = x @ W_ih + b_ih ; single fused recurrent matmul for r/z/n.
        gh = jnp.dot(h.astype(w_hh.dtype), w_hh,
                     preferred_element_type=jnp.float32) + b_hh      # (1, 3H) f32
        r = jax.nn.sigmoid(gi[:, :H] + gh[:, :H])
        z = jax.nn.sigmoid(gi[:, H:2 * H] + gh[:, H:2 * H])
        n = jnp.tanh(gi[:, 2 * H:] + r * gh[:, 2 * H:])              # r applied inside tanh
        return n + z * (h - n)                                       # == (1 - z) * n + z * h

    # 3) Serial recurrence: h lives in vregs; only h @ W_hh remains per token.
    h = h0_ref[...]                                                  # (1, H) f32
    rows = []
    for t in range(S):                                               # static unroll (S small)
        h = gru_cell(gi_seq[t:t + 1, :], h)
        # Extra "layers" re-apply the same GRU with x = h (tutorial EncoderRNN semantics).
        for _ in range(n_layers - 1):
            gi_h = jnp.dot(h.astype(w_ih.dtype), w_ih,
                           preferred_element_type=jnp.float32) + b_ih
            h = gru_cell(gi_h, h)
        rows.append(h)

    # 4) One unmasked, lane-dense (S, H) store; Pallas writes the block back to HBM once.
    out_ref[...] = jnp.concatenate(rows, axis=0)


def make_params(key, vocab_size, hidden_size):
    """Synthetic f32 parameters with PyTorch layout (weight_*_l0 transposed to (H, 3H))."""
    H = hidden_size
    k_emb, k_wih, k_whh, k_bih, k_bhh = jax.random.split(key, 5)
    scale = 1.0 / jnp.sqrt(H)
    emb = jax.random.normal(k_emb, (vocab_size, H), jnp.float32)
    wih_t = jax.random.uniform(k_wih, (H, 3 * H), jnp.float32, -scale, scale)  # cols [r|z|n]
    whh_t = jax.random.uniform(k_whh, (H, 3 * H), jnp.float32, -scale, scale)
    bih = jax.random.uniform(k_bih, (1, 3 * H), jnp.float32, -scale, scale)
    bhh = jax.random.uniform(k_bhh, (1, 3 * H), jnp.float32, -scale, scale)
    return emb, wih_t, whh_t, bih, bhh


def pack_params(emb, wih_t, whh_t, bih, bhh, *, weight_dtype=jnp.bfloat16):
    """Cast PyTorch-layout GRU params to the dtypes the kernel consumes."""
    return (emb.astype(weight_dtype),
            wih_t.astype(weight_dtype),
            whh_t.astype(weight_dtype),
            bih.astype(jnp.float32),
            bhh.astype(jnp.float32))


@functools.partial(jax.jit, static_argnames=("n_layers",))
def encoder_rnn_encode(tokens, hidden, packed, *, n_layers=1):
    """Run EncoderRNN over a whole token sequence in ONE single-program pallas_call.

    tokens: (S,) int32; hidden: (1, 1, H) f32.
    Returns (outputs (S, H) f32, final hidden (1, 1, H) f32).
    """
    emb, w_ih, w_hh, b_ih, b_hh = packed
    V, H = emb.shape
    S = tokens.shape[0]
    h0 = hidden.reshape(1, H).astype(jnp.float32)
    tok2d = tokens.reshape(S, 1).astype(jnp.int32)

    kernel = functools.partial(_gru_encoder_kernel, hidden_size=H, n_layers=n_layers,
                               seq_len=S, vocab_size=V)
    vmem = pltpu.MemorySpace.VMEM
    out_seq = pl.pallas_call(
        kernel,
        out_shape=jax.ShapeDtypeStruct((S, H), jnp.float32),
        in_specs=[pl.BlockSpec(memory_space=vmem)] * 7,   # whole arrays, VMEM-resident
        out_specs=pl.BlockSpec(memory_space=vmem),
        # TODO(synk): for long sequences, tile out_specs over time chunks and/or shard a
        # batch dimension across the two v7x TensorCores; a single sequence is inherently
        # serial, so one core is used here.
    )(tok2d, emb, w_ih, w_hh, b_ih, b_hh, h0)

    return out_seq, out_seq[-1:].reshape(1, 1, H)


def encoder_rnn_forward(token, hidden, packed, *, n_layers=1):
    """Module-faithful EncoderRNN.forward: one token -> (output (1,1,H), hidden (1,1,H))."""
    out_seq, h_out = encoder_rnn_encode(token.reshape(1), hidden, packed, n_layers=n_layers)
    H = out_seq.shape[-1]
    # output == hidden for this module (seq_len=1, the same GRU re-applied n_layers times).
    return out_seq.reshape(1, 1, H), h_out


def _reference_encode(tokens, hidden, packed, *, n_layers=1):
    """Pure-JAX reference of the PyTorch semantics, mirroring the kernel's bf16 MXU inputs."""
    emb, w_ih, w_hh, b_ih, b_hh = packed
    H = emb.shape[1]
    f32 = jnp.float32
    hi = jax.lax.Precision.HIGHEST
    w_ih_f = w_ih.astype(f32)
    w_hh_f = w_hh.astype(f32)

    def rnd(a):  # mirror the kernel's bf16 cast at the MXU inputs
        return a.astype(emb.dtype).astype(f32)

    def cell(gi, h):
        gh = jnp.dot(rnd(h), w_hh_f, precision=hi) + b_hh
        r = jax.nn.sigmoid(gi[:, :H] + gh[:, :H])
        z = jax.nn.sigmoid(gi[:, H:2 * H] + gh[:, H:2 * H])
        n = jnp.tanh(gi[:, 2 * H:] + r * gh[:, 2 * H:])
        return n + z * (h - n)

    h = hidden.reshape(1, H).astype(f32)
    outs = []
    for t in range(tokens.shape[0]):
        x = emb[tokens[t]].astype(f32)[None, :]
        gi = jnp.dot(rnd(x), w_ih_f, precision=hi) + b_ih
        h = cell(gi, h)
        for _ in range(n_layers - 1):
            gi = jnp.dot(rnd(h), w_ih_f, precision=hi) + b_ih
            h = cell(gi, h)
        outs.append(h)
    return jnp.concatenate(outs, axis=0), h.reshape(1, 1, H)


if __name__ == "__main__":
    VOCAB = 64
    HIDDEN = 256        # matches the module's hidden_size (keeps all gate slices 128-aligned)
    SEQ = 8

    key = jax.random.PRNGKey(0)
    k_params, k_tok, k_h = jax.random.split(key, 3)

    raw_params = make_params(k_params, VOCAB, HIDDEN)
    packed = pack_params(*raw_params)

    tokens = jax.random.randint(k_tok, (SEQ,), 0, VOCAB, dtype=jnp.int32)
    # EncoderRNN.init_hidden() is zeros; a random hidden exercises the GRU math fully.
    hidden = jax.random.normal(k_h, (1, 1, HIDDEN), jnp.float32)

    # 1) Module-faithful single-token forward (n_layers=1, the module default).
    out1, h1 = encoder_rnn_forward(tokens[:1], hidden, packed, n_layers=1)
    jax.block_until_ready((out1, h1))
    ref_seq1, ref_h1 = _reference_encode(tokens[:1], hidden, packed, n_layers=1)
    assert out1.shape == (1, 1, HIDDEN) and h1.shape == (1, 1, HIDDEN)
    assert jnp.allclose(out1.reshape(1, HIDDEN), ref_seq1, atol=1e-3, rtol=1e-3)
    assert jnp.allclose(h1, ref_h1, atol=1e-3, rtol=1e-3)

    # 2) Fused whole-sequence encode (one single-program pallas_call), n_layers=2.
    out_seq, h_fin = encoder_rnn_encode(tokens, hidden, packed, n_layers=2)
    jax.block_until_ready((out_seq, h_fin))
    ref_seq2, ref_h2 = _reference_encode(tokens, hidden, packed, n_layers=2)
    assert out_seq.shape == (SEQ, HIDDEN) and h_fin.shape == (1, 1, HIDDEN)
    assert jnp.allclose(out_seq, ref_seq2, atol=1e-3, rtol=1e-3)
    assert jnp.allclose(h_fin, ref_h2, atol=1e-3, rtol=1e-3)

    print("KERNEL_OK")
</pallas_src>

<mosaic_0001>
module attributes {stable_mosaic.version = 11 : i64} {
  func.func @_gru_encoder_kernel(%arg0: memref<1x1xi32, #tpu.memory_space<vmem>>, %arg1: memref<64x256xbf16, #tpu.memory_space<vmem>>, %arg2: memref<256x768xbf16, #tpu.memory_space<vmem>>, %arg3: memref<256x768xbf16, #tpu.memory_space<vmem>>, %arg4: memref<1x768xf32, #tpu.memory_space<vmem>>, %arg5: memref<1x768xf32, #tpu.memory_space<vmem>>, %arg6: memref<1x256xf32, #tpu.memory_space<vmem>>, %arg7: memref<1x256xf32, #tpu.memory_space<vmem>>) attributes {dimension_semantics = [], scalar_prefetch = 0 : i64, scratch_operands = 0 : i64, tpu.core_type = #tpu.core_type<tc>} {
    %c0 = arith.constant 0 : index
    %c0_0 = arith.constant 0 : index
    %0 = vector.load %arg2[%c0, %c0_0] : memref<256x768xbf16, #tpu.memory_space<vmem>>, vector<256x768xbf16>
    %c0_1 = arith.constant 0 : index
    %c0_2 = arith.constant 0 : index
    %1 = vector.load %arg3[%c0_1, %c0_2] : memref<256x768xbf16, #tpu.memory_space<vmem>>, vector<256x768xbf16>
    %c0_3 = arith.constant 0 : index
    %c0_4 = arith.constant 0 : index
    %2 = vector.load %arg4[%c0_3, %c0_4] : memref<1x768xf32, #tpu.memory_space<vmem>>, vector<1x768xf32>
    %c0_5 = arith.constant 0 : index
    %c0_6 = arith.constant 0 : index
    %3 = vector.load %arg5[%c0_5, %c0_6] : memref<1x768xf32, #tpu.memory_space<vmem>>, vector<1x768xf32>
    %c0_7 = arith.constant 0 : index
    %c0_8 = arith.constant 0 : index
    %4 = vector.load %arg0[%c0_7, %c0_8] : memref<1x1xi32, #tpu.memory_space<vmem>>, vector<1x1xi32>
    %5 = tpu.iota {dimensions = array<i32: 1>} : vector<1x64xi32>
    %6 = vector.broadcast %4 : vector<1x1xi32> to vector<1x64xi32>
    %7 = arith.cmpi eq, %6, %5 : vector<1x64xi32>
    %8 = arith.extui %7 : vector<1x64xi1> to vector<1x64xi32>
    %9 = arith.sitofp %8 : vector<1x64xi32> to vector<1x64xf32>
    %10 = arith.truncf %9 : vector<1x64xf32> to vector<1x64xbf16>
    %c0_9 = arith.constant 0 : index
    %c0_10 = arith.constant 0 : index
    %11 = vector.load %arg1[%c0_9, %c0_10] : memref<64x256xbf16, #tpu.memory_space<vmem>>, vector<64x256xbf16>
    %cst = arith.constant dense<0.000000e+00> : vector<1x256xf32>
    %12 = tpu.matmul %10, %11, %cst {dimension_numbers = #tpu.dot_dimension_numbers<[1], [0], [0], [1], [0, 0, 1, 1], [], []>} : vector<1x64xbf16>, vector<64x256xbf16>, vector<1x256xf32> -> vector<1x256xf32>
    %13 = arith.truncf %12 : vector<1x256xf32> to vector<1x256xbf16>
    %cst_11 = arith.constant dense<0.000000e+00> : vector<1x768xf32>
    %14 = tpu.matmul %13, %0, %cst_11 {dimension_numbers = #tpu.dot_dimension_numbers<[1], [0], [0], [1], [0, 0, 1, 1], [], []>} : vector<1x256xbf16>, vector<256x768xbf16>, vector<1x768xf32> -> vector<1x768xf32>
    %15 = arith.addf %14, %2 : vector<1x768xf32>
    %c0_12 = arith.constant 0 : index
    %c0_13 = arith.constant 0 : index
    %16 = vector.load %arg6[%c0_12, %c0_13] : memref<1x256xf32, #tpu.memory_space<vmem>>, vector<1x256xf32>
    %17 = arith.truncf %16 : vector<1x256xf32> to vector<1x256xbf16>
    %cst_14 = arith.constant dense<0.000000e+00> : vector<1x768xf32>
    %18 = tpu.matmul %17, %1, %cst_14 {dimension_numbers = #tpu.dot_dimension_numbers<[1], [0], [0], [1], [0, 0, 1, 1], [], []>} : vector<1x256xbf16>, vector<256x768xbf16>, vector<1x768xf32> -> vector<1x768xf32>
    %19 = arith.addf %18, %3 : vector<1x768xf32>
    %20 = vector.extract_strided_slice %15 {offsets = [0, 0], sizes = [1, 256], strides = [1, 1]} : vector<1x768xf32> to vector<1x256xf32>
    %21 = vector.extract_strided_slice %19 {offsets = [0, 0], sizes = [1, 256], strides = [1, 1]} : vector<1x768xf32> to vector<1x256xf32>
    %22 = arith.addf %20, %21 : vector<1x256xf32>
    %23 = arith.negf %22 : vector<1x256xf32>
    %24 = math.exp %23 : vector<1x256xf32>
    %cst_15 = arith.constant 1.000000e+00 : f32
    %25 = vector.broadcast %cst_15 : f32 to vector<1x256xf32>
    %26 = arith.addf %25, %24 : vector<1x256xf32>
    %27 = arith.divf %25, %26 : vector<1x256xf32>
    %28 = vector.extract_strided_slice %15 {offsets = [0, 256], sizes = [1, 256], strides = [1, 1]} : vector<1x768xf32> to vector<1x256xf32>
    %29 = vector.extract_strided_slice %19 {offsets = [0, 256], sizes = [1, 256], strides = [1, 1]} : vector<1x768xf32> to vector<1x256xf32>
    %30 = arith.addf %28, %29 : vector<1x256xf32>
    %31 = arith.negf %30 : vector<1x256xf32>
    %32 = math.exp %31 : vector<1x256xf32>
    %cst_16 = arith.constant 1.000000e+00 : f32
    %33 = vector.broadcast %cst_16 : f32 to vector<1x256xf32>
    %34 = arith.addf %33, %32 : vector<1x256xf32>
    %35 = arith.divf %33, %34 : vector<1x256xf32>
    %36 = vector.extract_strided_slice %15 {offsets = [0, 512], sizes = [1, 256], strides = [1, 1]} : vector<1x768xf32> to vector<1x256xf32>
    %37 = vector.extract_strided_slice %19 {offsets = [0, 512], sizes = [1, 256], strides = [1, 1]} : vector<1x768xf32> to vector<1x256xf32>
    %38 = arith.mulf %27, %37 : vector<1x256xf32>
    %39 = arith.addf %36, %38 : vector<1x256xf32>
    %40 = math.tanh %39 : vector<1x256xf32>
    %41 = arith.subf %16, %40 : vector<1x256xf32>
    %42 = arith.mulf %35, %41 : vector<1x256xf32>
    %43 = arith.addf %40, %42 : vector<1x256xf32>
    %c0_17 = arith.constant 0 : index
    %c0_18 = arith.constant 0 : index
    %44 = vector.load %arg7[%c0_17, %c0_18] : memref<1x256xf32, #tpu.memory_space<vmem>>, vector<1x256xf32>
    tpu.vector_store %arg7[%c0_17, %c0_18], %43 {strides = array<i32>} : memref<1x256xf32, #tpu.memory_space<vmem>>, vector<1x256xf32>,
    return
  }
}

</mosaic_0001>

<bundles_post_ra>
// kernel: encoder_rnn_encode.1
= control target key start
LH: loop header
LB: loop body
LE: loop exit
PB: predicated region body
PF: predicated region fallthrough
CT: control target
= control target key end

     0   :  { %s2527_s0 = inlined_call_operand.<no memory space> [shape: s32[1,1], index: 0, kind: input, shape index: {}]   ;;  %s2528_s1 = inlined_call_operand.hbm [shape: bf16[64,256], index: 1, kind: input, shape index: {}]   ;;  %s2529_s2 = inlined_call_operand.hbm [shape: bf16[256,768], index: 2, kind: input, shape index: {}]   ;;  %s2530_s3 = inlined_call_operand.hbm [shape: bf16[256,768], index: 3, kind: input, shape index: {}]   ;;  %s2531_s4 = inlined_call_operand.vmem [shape: f32[1,768], index: 4, kind: input, shape index: {}]   ;;  %s2532_s5 = inlined_call_operand.vmem [shape: f32[1,768], index: 5, kind: input, shape index: {}]   ;;  %s2533_s6 = inlined_call_operand.vmem [shape: f32[1,256], index: 6, kind: input, shape index: {}]   ;;  %s2534_s7 = inlined_call_operand.vmem [shape: f32[1,256], index: 7, kind: output, shape index: {}]  }
   0x1   :  { %v12_v0 = vstv %s2527_s0 }
   0x2   :  { %13 = vst [vmem:[#allocation2] sm:$0x1] %v12_v0 }
   0x3   :  { %14 = vsyncpa [#allocation4], 0 }
   0x4   :  { %15 = vsyncpa [#allocation6], 0  ;;  %s2375_s26 = smov [#allocation5]   ;;  %s2305_s30 = scalar_lea.hbm %s2529_s2, 12288 }
   0x5   :  { %s35_s27 = sshll.u32 %s2375_s26, 4  ;;  %p2306_p0 = scmp.ne.s32.totalorder %s2529_s2, %s2305_s30  ;;  %s36_s27 = int_to_ptr.vmem [resolvable:$true] %s35_s27 }
   0x6   :  { %p2309_p1 = scmp.lt.u32.totalorder %s2305_s30, %s2529_s2 }
   0x8   :  { %p2311_p2 = pnand %p2309_p1, %p2306_p0 }
   0xa   :  { %2314 = shalt.err (!%p2311_p2)
}
   0xb   :  { %s2315_s0 = scalar_lea.vmem %s36_s27, 12288  ;;  %p2320_p4 = scmp.lt.s32.totalorder %s36_s27, %s36_s27 }
   0xc   :  { %p2316_p3 = scmp.ne.s32.totalorder %s36_s27, %s2315_s0  ;;  %p2321_p5 = scmp.lt.s32.totalorder %s2315_s0, %s2315_s0 }
   0xe   :  { %p2322_p6 = por %p2321_p5, %p2320_p4 }
  0x10   :  { %p2323_p7 = pnand %p2322_p6, %p2316_p3 }
  0x12   :  { %2326 = shalt.err (!%p2323_p7)
}
  0x13   :  { %s2376_s12 = smov 384   ;;  %s2377_s13 = smov 24  }
  0x14   :  { %41 = dma.hbm_to_vmem [thread:$0]  %s2529_s2, 12288, %s36_s27, [#allocation6], %s2376_s12, %s2376_s12, %s2377_s13  }
  0x15   :  { %s2378_s16 = smov [#allocation3]   ;;  %s2327_s20 = scalar_lea.hbm %s2528_s1, 1024 }
  0x16   :  { %s23_s17 = sshll.u32 %s2378_s16, 4  ;;  %p2328_p8 = scmp.ne.s32.totalorder %s2528_s1, %s2327_s20  ;;  %s24_s17 = int_to_ptr.vmem [resolvable:$true] %s23_s17 }
  0x17   :  { %p2331_p9 = scmp.lt.u32.totalorder %s2327_s20, %s2528_s1 }
  0x19   :  { %p2333_p10 = pnand %p2331_p9, %p2328_p8 }
  0x1b   :  { %2336 = shalt.err (!%p2333_p10)
}
  0x1c   :  { %s2337_s25 = scalar_lea.vmem %s24_s17, 1024  ;;  %p2342_p12 = scmp.lt.s32.totalorder %s24_s17, %s24_s17 }
  0x1d   :  { %p2338_p11 = scmp.ne.s32.totalorder %s24_s17, %s2337_s25  ;;  %p2343_p13 = scmp.lt.s32.totalorder %s2337_s25, %s2337_s25 }
  0x1f   :  { %p2344_p0 = por %p2343_p13, %p2342_p12 }
  0x21   :  { %p2345_p1 = pnand %p2344_p0, %p2338_p11 }
  0x23   :  { %2348 = shalt.err (!%p2345_p1)
}
  0x24   :  { %s2379_s2 = smov 128   ;;  %s2380_s26 = smov 8  }
  0x25   :  { %29 = dma.hbm_to_vmem [thread:$0]  %s2528_s1, 1024, %s24_s17, [#allocation4], %s2379_s2, %s2379_s2, %s2380_s26  }
  0x26   :  { %s2381_s29 = smov [#allocation7]   ;;  %s2349_s10 = scalar_lea.hbm %s2530_s3, 12288 }
  0x27   :  { %s47_s30 = sshll.u32 %s2381_s29, 4  ;;  %p2350_p2 = scmp.ne.s32.totalorder %s2530_s3, %s2349_s10  ;;  %s48_s30 = int_to_ptr.vmem [resolvable:$true] %s47_s30 }
  0x28   :  { %p2353_p3 = scmp.lt.u32.totalorder %s2349_s10, %s2530_s3 }
  0x2a   :  { %p2355_p4 = pnand %p2353_p3, %p2350_p2 }
  0x2c   :  { %2358 = shalt.err (!%p2355_p4)
}
  0x2d   :  { %s2359_s16 = scalar_lea.vmem %s48_s30, 12288  ;;  %p2364_p6 = scmp.lt.s32.totalorder %s48_s30, %s48_s30 }
  0x2e   :  { %p2360_p5 = scmp.ne.s32.totalorder %s48_s30, %s2359_s16  ;;  %p2365_p7 = scmp.lt.s32.totalorder %s2359_s16, %s2359_s16 }
  0x30   :  { %p2366_p8 = por %p2365_p7, %p2364_p6 }
  0x32   :  { %p2367_p9 = pnand %p2366_p8, %p2360_p5 }
  0x34   :  { %2370 = shalt.err (!%p2367_p9)
}
  0x35   :  { %53 = dma.hbm_to_vmem [thread:$0]  %s2530_s3, 12288, %s48_s30, [#allocation6], %s2376_s12, %s2376_s12, %s2377_s13  }
  0x36   :  { %2371 = dma.done.wait [#allocation4], 1024  }
  0x37   :  { %2372 = vsyncadd [#allocation4], 4294966272 }
  0x38   :  { %2373 = dma.done.wait [#allocation6], 24576  }
  0x39   :  { %2374 = vsyncadd [#allocation6], 4294942720  ;;  %v2382_v1 = vmov 0   ;;  %v264_v2 = vld [vmem:[#allocation2] sm:$0x1]  ;;  %v265_v42 = vlaneseq  ;;  %v2383_v48 = vmov 0.0  }
  0x3a   :  { %1984 = vset.pattern.permute.xlu0 %v2382_v1  ;;  %362 = vmatprep.mubr.bf16.mxu0 %v2382_v1  ;;  %v1985_v3 = vld [vmem:[#allocation3 + $0x4] ss:$8 sps:$4 sm:$0xff]   ;;  %v1987_v4 = vld [vmem:[#allocation3] ss:$8 sps:$4 sm:$0xff]   ;;  %v1988_v5 = vld [vmem:[#allocation3 + $0x14] ss:$8 sps:$4 sm:$0xff]  }
  0x3b   :  { %268 = vperm.xlu0 %1984, %v264_v2   ;;  %330 = vmatprep.subr.bf16.mxu0 %v1985_v3  ;;  %v1990_v6 = vld [vmem:[#allocation3 + $0x10] ss:$8 sps:$4 sm:$0xff]   ;;  %v1991_v7 = vld [vmem:[#allocation3 + $0x24] ss:$8 sps:$4 sm:$0xff]   ;;  %v1993_v8 = vld [vmem:[#allocation3 + $0x20] ss:$8 sps:$4 sm:$0xff]  }
  0x3c   :  { %331 = vmatpush1.bf16.msra.mxu0 %v1987_v4  ;;  %v1994_v9 = vld [vmem:[#allocation3 + $0x34] ss:$8 sps:$4 sm:$0xff]   ;;  %v2002_v11 = vld [vmem:[#allocation5] ss:$24 sps:$4 sm:$0xff]   ;;  %v2008_v13 = vld [vmem:[#allocation5 + $0x30] ss:$24 sps:$4 sm:$0xff]  }
  0x3d   :  { %332 = vmatprep.subr.bf16.mxu0 %v1988_v5  ;;  %v1997_v10 = vld [vmem:[#allocation5 + $0x4] ss:$24 sps:$4 sm:$0xff]   ;;  %v2003_v12 = vld [vmem:[#allocation5 + $0x34] ss:$24 sps:$4 sm:$0xff]   ;;  %v1996_v14 = vld [vmem:[#allocation3 + $0x30] ss:$8 sps:$4 sm:$0xff]  }
  0x3e   :  { %884 = vmatprep.subr.bf16.mxu1 %v1997_v10  ;;  %v2009_v15 = vld [vmem:[#allocation5 + $0x64] ss:$24 sps:$4 sm:$0xff]   ;;  %v2014_v17 = vld [vmem:[#allocation5 + $0x60] ss:$24 sps:$4 sm:$0xff]   ;;  %v2015_v18 = vld [vmem:[#allocation5 + $0x94] ss:$24 sps:$4 sm:$0xff]  }
  0x3f   :  { %885 = vmatpush1.bf16.msra.mxu1 %v2002_v11  ;;  %v2001_v16 = vld [vmem:[#allocation5 + $0xc] ss:$24 sps:$4 sm:$0xff]   ;;  %v2020_v19 = vld [vmem:[#allocation5 + $0x90] ss:$24 sps:$4 sm:$0xff]   ;;  %v2026_v21 = vld [vmem:[#allocation5 + $0xc0] ss:$24 sps:$4 sm:$0xff]  }
  0x40   :  { %333 = vmatpush1.bf16.msra.mxu0 %v1990_v6  ;;  %886 = vmatprep.subr.bf16.mxu1 %v2003_v12  ;;  %v2021_v20 = vld [vmem:[#allocation5 + $0xc4] ss:$24 sps:$4 sm:$0xff]   ;;  %v2027_v22 = vld [vmem:[#allocation5 + $0xf4] ss:$24 sps:$4 sm:$0xff]   ;;  %v2032_v23 = vld [vmem:[#allocation5 + $0xf0] ss:$24 sps:$4 sm:$0xff]  }
  0x41   :  { %334 = vmatprep.subr.bf16.mxu0 %v1991_v7  ;;  %v2033_v24 = vld [vmem:[#allocation5 + $0x124] ss:$24 sps:$4 sm:$0xff]   ;;  %v2038_v25 = vld [vmem:[#allocation5 + $0x120] ss:$24 sps:$4 sm:$0xff]   ;;  %v2039_v26 = vld [vmem:[#allocation5 + $0x154] ss:$24 sps:$4 sm:$0xff]  }
  0x42   :  { %v2044_v27 = vld [vmem:[#allocation5 + $0x150] ss:$24 sps:$4 sm:$0xff]   ;;  %v2045_v28 = vld [vmem:[#allocation5 + $0x184] ss:$24 sps:$4 sm:$0xff]   ;;  %v2050_v29 = vld [vmem:[#allocation5 + $0x180] ss:$24 sps:$4 sm:$0xff]  }
  0x43   :  { %887 = vmatpush1.bf16.msra.mxu1 %v2008_v13  ;;  %v2051_v30 = vld [vmem:[#allocation5 + $0x1b4] ss:$24 sps:$4 sm:$0xff]   ;;  %v2056_v31 = vld [vmem:[#allocation5 + $0x1b0] ss:$24 sps:$4 sm:$0xff]   ;;  %v2057_v32 = vld [vmem:[#allocation5 + $0x1e4] ss:$24 sps:$4 sm:$0xff]  }
  0x44   :  { %335 = vmatpush1.bf16.msra.mxu0 %v1993_v8  ;;  %888 = vmatprep.subr.bf16.mxu1 %v2009_v15  ;;  %v2062_v33 = vld [vmem:[#allocation5 + $0x1e0] ss:$24 sps:$4 sm:$0xff]   ;;  %v2063_v34 = vld [vmem:[#allocation5 + $0x214] ss:$24 sps:$4 sm:$0xff]   ;;  %v2068_v35 = vld [vmem:[#allocation5 + $0x210] ss:$24 sps:$4 sm:$0xff]  }
  0x45   :  { %336 = vmatprep.subr.bf16.mxu0 %v1994_v9  ;;  %v2069_v36 = vld [vmem:[#allocation5 + $0x244] ss:$24 sps:$4 sm:$0xff]   ;;  %v2074_v37 = vld [vmem:[#allocation5 + $0x240] ss:$24 sps:$4 sm:$0xff]   ;;  %v2075_v38 = vld [vmem:[#allocation5 + $0x274] ss:$24 sps:$4 sm:$0xff]  }
  0x46   :  { %v2080_v39 = vld [vmem:[#allocation5 + $0x270] ss:$24 sps:$4 sm:$0xff]   ;;  %v2081_v40 = vld [vmem:[#allocation5 + $0x2a4] ss:$24 sps:$4 sm:$0xff]   ;;  %v2086_v41 = vld [vmem:[#allocation5 + $0x2a0] ss:$24 sps:$4 sm:$0xff]  }
  0x47   :  { %889 = vmatpush1.bf16.msra.mxu1 %v2014_v17  ;;  %v2471_v43 = vshrl.u32 %v265_v42, 7  ;;  %v266_v45 = vand.u32 127, %v265_v42  ;;  %vm326_vm1 = vcmask 523264   ;;  %v1999_v50 = vld [vmem:[#allocation5 + $0x8] ss:$24 sps:$4 sm:$0xff]   ;;  %vm1743_vm2 = vcmp.lt.s32.totalorder %v265_v42, 256 }
  0x48   :  { %337 = vmatpush1.bf16.msra.mxu0 %v1996_v14  ;;  %890 = vmatprep.subr.bf16.mxu1 %v2015_v18  ;;  %v2007_v52 = vld [vmem:[#allocation5 + $0x3c] ss:$24 sps:$4 sm:$0xff]   ;;  %v2005_v53 = vld [vmem:[#allocation5 + $0x38] ss:$24 sps:$4 sm:$0xff]   ;;  %v2013_v54 = vld [vmem:[#allocation5 + $0x6c] ss:$24 sps:$4 sm:$0xff]  }
  0x49   :  { %925 = vmatprep.subr.bf16.mxu0 %v2001_v16  ;;  %v2474_v44 = vsub.s32 0, %v2471_v43  ;;  %v2011_v55 = vld [vmem:[#allocation5 + $0x68] ss:$24 sps:$4 sm:$0xff]   ;;  %v2019_v56 = vld [vmem:[#allocation5 + $0x9c] ss:$24 sps:$4 sm:$0xff]  }
  0x4a   :  { %v2017_v57 = vld [vmem:[#allocation5 + $0x98] ss:$24 sps:$4 sm:$0xff]   ;;  %v2025_v58 = vld [vmem:[#allocation5 + $0xcc] ss:$24 sps:$4 sm:$0xff]   ;;  %v2023_v59 = vld [vmem:[#allocation5 + $0xc8] ss:$24 sps:$4 sm:$0xff]  }
  0x4b   :  { %891 = vmatpush1.bf16.msra.mxu1 %v2020_v19  ;;  %v2031_v60 = vld [vmem:[#allocation5 + $0xfc] ss:$24 sps:$4 sm:$0xff]   ;;  %v2029_v61 = vld [vmem:[#allocation5 + $0xf8] ss:$24 sps:$4 sm:$0xff]   ;;  %v2037_v62 = vld [vmem:[#allocation5 + $0x12c] ss:$24 sps:$4 sm:$0xff]  }
  0x4c   :  { %892 = vmatprep.subr.bf16.mxu1 %v2021_v20  ;;  %v2035_v63 = vld [vmem:[#allocation5 + $0x128] ss:$24 sps:$4 sm:$0xff]   ;;  %v2043_v0 = vld [vmem:[#allocation5 + $0x15c] ss:$24 sps:$4 sm:$0xff]   ;;  %v2041_v1 = vld [vmem:[#allocation5 + $0x158] ss:$24 sps:$4 sm:$0xff]  }
  0x4d   :  { %v2049_v2 = vld [vmem:[#allocation5 + $0x18c] ss:$24 sps:$4 sm:$0xff]   ;;  %v2047_v3 = vld [vmem:[#allocation5 + $0x188] ss:$24 sps:$4 sm:$0xff]   ;;  %v2055_v4 = vld [vmem:[#allocation5 + $0x1bc] ss:$24 sps:$4 sm:$0xff]  }
  0x4e   :  { %v2053_v5 = vld [vmem:[#allocation5 + $0x1b8] ss:$24 sps:$4 sm:$0xff]   ;;  %v2061_v6 = vld [vmem:[#allocation5 + $0x1ec] ss:$24 sps:$4 sm:$0xff]   ;;  %v2059_v7 = vld [vmem:[#allocation5 + $0x1e8] ss:$24 sps:$4 sm:$0xff]  }
  0x4f   :  { %893 = vmatpush1.bf16.msra.mxu1 %v2026_v21  ;;  %v2067_v8 = vld [vmem:[#allocation5 + $0x21c] ss:$24 sps:$4 sm:$0xff]   ;;  %v2065_v9 = vld [vmem:[#allocation5 + $0x218] ss:$24 sps:$4 sm:$0xff]   ;;  %v2073_v10 = vld [vmem:[#allocation5 + $0x24c] ss:$24 sps:$4 sm:$0xff]  }
  0x50   :  { %894 = vmatprep.subr.bf16.mxu1 %v2027_v22  ;;  %v2071_v11 = vld [vmem:[#allocation5 + $0x248] ss:$24 sps:$4 sm:$0xff]   ;;  %v2079_v12 = vld [vmem:[#allocation5 + $0x27c] ss:$24 sps:$4 sm:$0xff]   ;;  %v2077_v13 = vld [vmem:[#allocation5 + $0x278] ss:$24 sps:$4 sm:$0xff]  }
  0x51   :  { %v2085_v14 = vld [vmem:[#allocation5 + $0x2ac] ss:$24 sps:$4 sm:$0xff]   ;;  %v2083_v15 = vld [vmem:[#allocation5 + $0x2a8] ss:$24 sps:$4 sm:$0xff]   ;;  %v2091_v17 = vld [vmem:[#allocation5 + $0x2dc] ss:$24 sps:$4 sm:$0xff]  }
  0x52   :  { %v2087_v16 = vld [vmem:[#allocation5 + $0x2d4] ss:$24 sps:$4 sm:$0xff]   ;;  %v2089_v18 = vld [vmem:[#allocation5 + $0x2d8] ss:$24 sps:$4 sm:$0xff]   ;;  %v2479_v22 = vsub.s32 1, %v2471_v43 }
  0x53   :  { %895 = vmatpush1.bf16.msra.mxu1 %v2032_v23  ;;  %v2092_v19 = vld [vmem:[#allocation5 + $0x2d0] ss:$24 sps:$4 sm:$0xff]   ;;  %v2095_v20 = vld [vmem:[#allocation5 + $0x14] ss:$24 sps:$4 sm:$0xff]   ;;  %v2484_v23 = vld [vmem:[%s2533_s6] sm:$0x3] }
  0x54   :  { %896 = vmatprep.subr.bf16.mxu1 %v2033_v24  ;;  %v2098_v21 = vld [vmem:[#allocation7 + $0xc] ss:$24 sps:$4 sm:$0xff]  }
  0x57   :  { %897 = vmatpush1.bf16.msra.mxu1 %v2038_v25  ;;  %v1016_v25 = vrot.slane %v2484_v23, %v2479_v22 }
  0x58   :  { %898 = vmatprep.subr.bf16.mxu1 %v2039_v26 }
  0x5b   :  { %899 = vmatpush1.bf16.msra.mxu1 %v2044_v27 }
  0x5c   :  { %900 = vmatprep.subr.bf16.mxu1 %v2045_v28 }
  0x5f   :  { %901 = vmatpush1.bf16.msra.mxu1 %v2050_v29  ;;  %v2093_v29 = vld [vmem:[#allocation5 + $0x10] ss:$24 sps:$4 sm:$0xff]  }
  0x60   :  { %902 = vmatprep.subr.bf16.mxu1 %v2051_v30  ;;  %v2096_v30 = vld [vmem:[#allocation7 + $0x8] ss:$24 sps:$4 sm:$0xff]  }
  0x63   :  { %903 = vmatpush1.bf16.msra.mxu1 %v2056_v31 }
  0x64   :  { %904 = vmatprep.subr.bf16.mxu1 %v2057_v32 }
  0x67   :  { %905 = vmatpush1.bf16.msra.mxu1 %v2062_v33  ;;  %v2101_v33 = vld [vmem:[#allocation5 + $0x44] ss:$24 sps:$4 sm:$0xff]  }
  0x68   :  { %906 = vmatprep.subr.bf16.mxu1 %v2063_v34  ;;  %v2104_v34 = vld [vmem:[#allocation7 + $0x3c] ss:$24 sps:$4 sm:$0xff]  }
  0x6b   :  { %907 = vmatpush1.bf16.msra.mxu1 %v2068_v35  ;;  %v2490_v35 = vpack.c.bf16 %v1016_v25, %v1016_v25  ;;  %v2171_v25 = vld [vmem:[#allocation5 + $0x280] ss:$24 sps:$4 sm:$0xff]  }
  0x6c   :  { %908 = vmatprep.subr.bf16.mxu1 %v2069_v36  ;;  %v2099_v36 = vld [vmem:[#allocation5 + $0x40] ss:$24 sps:$4 sm:$0xff]  }
  0x6f   :  { %909 = vmatpush1.bf16.msra.mxu1 %v2074_v37  ;;  %v2102_v37 = vld [vmem:[#allocation7 + $0x38] ss:$24 sps:$4 sm:$0xff]  }
  0x70   :  { %910 = vmatprep.subr.bf16.mxu1 %v2075_v38  ;;  %v2107_v38 = vld [vmem:[#allocation5 + $0x74] ss:$24 sps:$4 sm:$0xff]  }
  0x73   :  { %911 = vmatpush1.bf16.msra.mxu1 %v2080_v39  ;;  %v2110_v39 = vld [vmem:[#allocation7 + $0x6c] ss:$24 sps:$4 sm:$0xff]  }
  0x74   :  { %912 = vmatprep.subr.bf16.mxu1 %v2081_v40  ;;  %v2105_v40 = vld [vmem:[#allocation5 + $0x70] ss:$24 sps:$4 sm:$0xff]  }
  0x77   :  { %913 = vmatpush1.bf16.msra.mxu1 %v2086_v41  ;;  %v2108_v41 = vld [vmem:[#allocation7 + $0x68] ss:$24 sps:$4 sm:$0xff]  }
  0x78   :  { %914 = vmatprep.subr.bf16.mxu1 %v2087_v16  ;;  %v2162_v16 = vld [vmem:[#allocation7 + $0x218] ss:$24 sps:$4 sm:$0xff]  }
  0x7b   :  { %915 = vmatpush1.bf16.msra.mxu1 %v2092_v19  ;;  %v2165_v19 = vld [vmem:[#allocation5 + $0x250] ss:$24 sps:$4 sm:$0xff]  }
  0x7c   :  { %966 = vmatprep.subr.bf16.mxu1 %v2095_v20  ;;  %v2168_v20 = vld [vmem:[#allocation7 + $0x248] ss:$24 sps:$4 sm:$0xff]  }
  0xba   :  { %v269_v46 = vpop.permute.xlu0 %268 }
  0xbb   :  { %v273_v47 = vrot.slane %v269_v46, %v2474_v44  ;;  %v2116_v46 = vld [vmem:[#allocation7 + $0x9c] ss:$24 sps:$4 sm:$0xff]  }
  0xbd   :  { %vm274_vm0 = vcmp.eq.s32.totalorder %v273_v47, %v266_v45  ;;  %v2113_v45 = vld [vmem:[#allocation5 + $0xa4] ss:$24 sps:$4 sm:$0xff]   ;;  %v2111_v47 = vld [vmem:[#allocation5 + $0xa0] ss:$24 sps:$4 sm:$0xff]  }
  0xbe   :  { %v1752_v49 = vsel %vm274_vm0, 1.0, %v2383_v48  ;;  %v2114_v48 = vld [vmem:[#allocation7 + $0x98] ss:$24 sps:$4 sm:$0xff]  }
  0xbf   :  { %v277_v51 = vpack.c.bf16 %v1752_v49, %v1752_v49  ;;  %v2119_v49 = vld [vmem:[#allocation5 + $0xd4] ss:$24 sps:$4 sm:$0xff]  }
  0xc1   :  { %1761 = vmatmul.mubr.msk.bf16.vlgmr.msra.gmra.mrb[0].mxu0 %vm326_vm1, %v277_v51  ;;  %v2117_v51 = vld [vmem:[#allocation5 + $0xd0] ss:$24 sps:$4 sm:$0xff]  }
  0xc2   :  { %926 = vmatpush1.bf16.msra.mxu0 %v1999_v50  ;;  %v2122_v50 = vld [vmem:[#allocation7 + $0xcc] ss:$24 sps:$4 sm:$0xff]  }
  0xc3   :  { %927 = vmatprep.subr.bf16.mxu0 %v2007_v52  ;;  %v2120_v52 = vld [vmem:[#allocation7 + $0xc8] ss:$24 sps:$4 sm:$0xff]  }
  0xc6   :  { %928 = vmatpush1.bf16.msra.mxu0 %v2005_v53  ;;  %v2125_v53 = vld [vmem:[#allocation5 + $0x104] ss:$24 sps:$4 sm:$0xff]  }
  0xc7   :  { %929 = vmatprep.subr.bf16.mxu0 %v2013_v54  ;;  %v2128_v54 = vld [vmem:[#allocation7 + $0xfc] ss:$24 sps:$4 sm:$0xff]  }
  0xca   :  { %930 = vmatpush1.bf16.msra.mxu0 %v2011_v55  ;;  %v2123_v55 = vld [vmem:[#allocation5 + $0x100] ss:$24 sps:$4 sm:$0xff]  }
  0xcb   :  { %931 = vmatprep.subr.bf16.mxu0 %v2019_v56  ;;  %v2126_v56 = vld [vmem:[#allocation7 + $0xf8] ss:$24 sps:$4 sm:$0xff]  }
  0xce   :  { %932 = vmatpush1.bf16.msra.mxu0 %v2017_v57  ;;  %v2131_v57 = vld [vmem:[#allocation5 + $0x134] ss:$24 sps:$4 sm:$0xff]  }
  0xcf   :  { %933 = vmatprep.subr.bf16.mxu0 %v2025_v58  ;;  %v2134_v58 = vld [vmem:[#allocation7 + $0x12c] ss:$24 sps:$4 sm:$0xff]  }
  0xd2   :  { %934 = vmatpush1.bf16.msra.mxu0 %v2023_v59  ;;  %v2129_v59 = vld [vmem:[#allocation5 + $0x130] ss:$24 sps:$4 sm:$0xff]  }
  0xd3   :  { %935 = vmatprep.subr.bf16.mxu0 %v2031_v60  ;;  %v2132_v60 = vld [vmem:[#allocation7 + $0x128] ss:$24 sps:$4 sm:$0xff]  }
  0xd6   :  { %936 = vmatpush1.bf16.msra.mxu0 %v2029_v61  ;;  %v2137_v61 = vld [vmem:[#allocation5 + $0x164] ss:$24 sps:$4 sm:$0xff]  }
  0xd7   :  { %937 = vmatprep.subr.bf16.mxu0 %v2037_v62  ;;  %v2140_v62 = vld [vmem:[#allocation7 + $0x15c] ss:$24 sps:$4 sm:$0xff]  }
  0xda   :  { %938 = vmatpush1.bf16.msra.mxu0 %v2035_v63  ;;  %v2135_v63 = vld [vmem:[#allocation5 + $0x160] ss:$24 sps:$4 sm:$0xff]  }
  0xdb   :  { %939 = vmatprep.subr.bf16.mxu0 %v2043_v0  ;;  %v2138_v0 = vld [vmem:[#allocation7 + $0x158] ss:$24 sps:$4 sm:$0xff]  }
  0xde   :  { %940 = vmatpush1.bf16.msra.mxu0 %v2041_v1  ;;  %v2143_v1 = vld [vmem:[#allocation5 + $0x194] ss:$24 sps:$4 sm:$0xff]  }
  0xdf   :  { %941 = vmatprep.subr.bf16.mxu0 %v2049_v2  ;;  %v2146_v2 = vld [vmem:[#allocation7 + $0x18c] ss:$24 sps:$4 sm:$0xff]  }
  0xe2   :  { %942 = vmatpush1.bf16.msra.mxu0 %v2047_v3  ;;  %v2141_v3 = vld [vmem:[#allocation5 + $0x190] ss:$24 sps:$4 sm:$0xff]  }
  0xe3   :  { %943 = vmatprep.subr.bf16.mxu0 %v2055_v4  ;;  %v2144_v4 = vld [vmem:[#allocation7 + $0x188] ss:$24 sps:$4 sm:$0xff]  }
  0xe6   :  { %944 = vmatpush1.bf16.msra.mxu0 %v2053_v5  ;;  %v2149_v5 = vld [vmem:[#allocation5 + $0x1c4] ss:$24 sps:$4 sm:$0xff]  }
  0xe7   :  { %945 = vmatprep.subr.bf16.mxu0 %v2061_v6  ;;  %v2152_v6 = vld [vmem:[#allocation7 + $0x1bc] ss:$24 sps:$4 sm:$0xff]  }
  0xea   :  { %946 = vmatpush1.bf16.msra.mxu0 %v2059_v7  ;;  %v2147_v7 = vld [vmem:[#allocation5 + $0x1c0] ss:$24 sps:$4 sm:$0xff]  }
  0xeb   :  { %947 = vmatprep.subr.bf16.mxu0 %v2067_v8  ;;  %v2150_v8 = vld [vmem:[#allocation7 + $0x1b8] ss:$24 sps:$4 sm:$0xff]  }
  0xee   :  { %948 = vmatpush1.bf16.msra.mxu0 %v2065_v9  ;;  %v2155_v9 = vld [vmem:[#allocation5 + $0x1f4] ss:$24 sps:$4 sm:$0xff]  }
  0xef   :  { %949 = vmatprep.subr.bf16.mxu0 %v2073_v10  ;;  %v2158_v10 = vld [vmem:[#allocation7 + $0x1ec] ss:$24 sps:$4 sm:$0xff]  }
  0xf2   :  { %950 = vmatpush1.bf16.msra.mxu0 %v2071_v11  ;;  %v2153_v11 = vld [vmem:[#allocation5 + $0x1f0] ss:$24 sps:$4 sm:$0xff]  }
  0xf3   :  { %951 = vmatprep.subr.bf16.mxu0 %v2079_v12  ;;  %v2156_v12 = vld [vmem:[#allocation7 + $0x1e8] ss:$24 sps:$4 sm:$0xff]  }
  0xf6   :  { %952 = vmatpush1.bf16.msra.mxu0 %v2077_v13  ;;  %v2161_v13 = vld [vmem:[#allocation5 + $0x224] ss:$24 sps:$4 sm:$0xff]  }
  0xf7   :  { %953 = vmatprep.subr.bf16.mxu0 %v2085_v14  ;;  %v2164_v14 = vld [vmem:[#allocation7 + $0x21c] ss:$24 sps:$4 sm:$0xff]  }
  0xfa   :  { %954 = vmatpush1.bf16.msra.mxu0 %v2083_v15  ;;  %v2159_v15 = vld [vmem:[#allocation5 + $0x220] ss:$24 sps:$4 sm:$0xff]  }
  0xfb   :  { %955 = vmatprep.subr.bf16.mxu0 %v2091_v17  ;;  %v2167_v17 = vld [vmem:[#allocation5 + $0x254] ss:$24 sps:$4 sm:$0xff]  }
  0xfe   :  { %956 = vmatpush1.bf16.msra.mxu0 %v2089_v18  ;;  %v2170_v18 = vld [vmem:[#allocation7 + $0x24c] ss:$24 sps:$4 sm:$0xff]  }
  0xff   :  { %1573 = vmatprep.subr.bf16.mxu0 %v2098_v21  ;;  %v2173_v21 = vld [vmem:[#allocation5 + $0x284] ss:$24 sps:$4 sm:$0xff]  }
 0x194   :  { %v364_v24 = vpop.f32.mrb[0].mxu0 }
 0x195   :  { %v366_v26 = vpop.f32.mrb[1].mxu0  ;;  %v2488_v31 = vpack.c.bf16 %v364_v24, %v364_v24  ;;  %v2176_v24 = vld [vmem:[#allocation7 + $0x27c] ss:$24 sps:$4 sm:$0xff]  }
 0x196   :  { %v372_v27 = vpack.c.bf16 %v366_v26, %v366_v26  ;;  %v368_v28 = vpop.f32.mrb[2].mxu0  ;;  %v2174_v26 = vld [vmem:[#allocation7 + $0x278] ss:$24 sps:$4 sm:$0xff]  }
 0x197   :  { %v369_v32 = vpop.f32.mrb[3].mxu0  ;;  %v2182_v28 = vld [vmem:[#allocation7 + $0x2ac] ss:$24 sps:$4 sm:$0xff]  }
 0x198   :  { %916 = vmatprep.mubr.bf16.mxu1 %v372_v27  ;;  %957 = vmatprep.mubr.bf16.mxu0 %v372_v27  ;;  %v2185_v32 = vld [vmem:[#allocation5 + $0x2e4] ss:$24 sps:$4 sm:$0xff]  }
 0x199   :  { %917 = vmatmul.mubr.bf16.vlgmr.msra.gmra.mrb[0].mxu1 %v2488_v31  ;;  %958 = vmatmul.mubr.bf16.vlgmr.msra.gmra.mrb[4].mxu0 %v2488_v31 }
 0x19a   :  { %967 = vmatpush1.bf16.msra.mxu1 %v2093_v29  ;;  %1574 = vmatpush1.bf16.msra.mxu0 %v2096_v30  ;;  %v2177_v29 = vld [vmem:[#allocation5 + $0x2b0] ss:$24 sps:$4 sm:$0xff]  }
 0x19b   :  { %998 = vmatprep.mubr.bf16.mxu1 %v372_v27  ;;  %968 = vmatprep.subr.bf16.mxu1 %v2101_v33  ;;  %v2179_v27 = vld [vmem:[#allocation5 + $0x2b4] ss:$24 sps:$4 sm:$0xff]   ;;  %v2180_v30 = vld [vmem:[#allocation7 + $0x2a8] ss:$24 sps:$4 sm:$0xff]  }
 0x19c   :  { %1575 = vmatprep.subr.bf16.mxu0 %v2104_v34  ;;  %1605 = vmatprep.mubr.bf16.mxu0 %v2490_v35  ;;  %v2188_v33 = vld [vmem:[#allocation7 + $0x2dc] ss:$24 sps:$4 sm:$0xff]   ;;  %v1012_v34 = vrot.slane %v2484_v23, %v2474_v44 }
 0x19e   :  { %969 = vmatpush1.bf16.msra.mxu1 %v2099_v36  ;;  %1576 = vmatpush1.bf16.msra.mxu0 %v2102_v37  ;;  %v2183_v36 = vld [vmem:[#allocation5 + $0x2e0] ss:$24 sps:$4 sm:$0xff]  }
 0x19f   :  { %970 = vmatprep.subr.bf16.mxu1 %v2107_v38  ;;  %1577 = vmatprep.subr.bf16.mxu0 %v2110_v39  ;;  %v2186_v37 = vld [vmem:[#allocation7 + $0x2d8] ss:$24 sps:$4 sm:$0xff]   ;;  %v2191_v38 = vld [vmem:[#allocation7 + $0x4] ss:$24 sps:$4 sm:$0xff]   ;;  %v2209_v39 = vld [vmem:[#allocation7 + $0x14] ss:$24 sps:$4 sm:$0xff]  }
 0x1a2   :  { %971 = vmatpush1.bf16.msra.mxu1 %v2105_v40  ;;  %1578 = vmatpush1.bf16.msra.mxu0 %v2108_v41  ;;  %v2497_v40 = vpack.c.bf16 %v1012_v34, %v1012_v34  ;;  %v2189_v41 = vld [vmem:[#allocation7] ss:$24 sps:$4 sm:$0xff]  }
 0x1a3   :  { %972 = vmatprep.subr.bf16.mxu1 %v2113_v45  ;;  %1579 = vmatprep.subr.bf16.mxu0 %v2116_v46  ;;  %v2207_v45 = vld [vmem:[#allocation7 + $0x10] ss:$24 sps:$4 sm:$0xff]   ;;  %v2194_v46 = vld [vmem:[#allocation7 + $0x34] ss:$24 sps:$4 sm:$0xff]   ;;  %v2276_v34 = vld [vmem:[#allocation7 + $0x280] ss:$24 sps:$4 sm:$0xff]  }
 0x1a6   :  { %973 = vmatpush1.bf16.msra.mxu1 %v2111_v47  ;;  %1580 = vmatpush1.bf16.msra.mxu0 %v2114_v48  ;;  %v2215_v47 = vld [vmem:[#allocation7 + $0x44] ss:$24 sps:$4 sm:$0xff]   ;;  %v2192_v48 = vld [vmem:[#allocation7 + $0x30] ss:$24 sps:$4 sm:$0xff]  }
 0x1a7   :  { %974 = vmatprep.subr.bf16.mxu1 %v2119_v49  ;;  %1581 = vmatprep.subr.bf16.mxu0 %v2122_v50  ;;  %v2213_v49 = vld [vmem:[#allocation7 + $0x40] ss:$24 sps:$4 sm:$0xff]   ;;  %v2197_v50 = vld [vmem:[#allocation7 + $0x64] ss:$24 sps:$4 sm:$0xff]  }
 0x1aa   :  { %975 = vmatpush1.bf16.msra.mxu1 %v2117_v51  ;;  %1582 = vmatpush1.bf16.msra.mxu0 %v2120_v52  ;;  %v2221_v51 = vld [vmem:[#allocation7 + $0x74] ss:$24 sps:$4 sm:$0xff]   ;;  %v2195_v52 = vld [vmem:[#allocation7 + $0x60] ss:$24 sps:$4 sm:$0xff]  }
 0x1ab   :  { %976 = vmatprep.subr.bf16.mxu1 %v2125_v53  ;;  %1583 = vmatprep.subr.bf16.mxu0 %v2128_v54  ;;  %v2219_v53 = vld [vmem:[#allocation7 + $0x70] ss:$24 sps:$4 sm:$0xff]   ;;  %v2227_v54 = vld [vmem:[#allocation7 + $0xa4] ss:$24 sps:$4 sm:$0xff]  }
 0x1ae   :  { %977 = vmatpush1.bf16.msra.mxu1 %v2123_v55  ;;  %1584 = vmatpush1.bf16.msra.mxu0 %v2126_v56  ;;  %v2198_v55 = vld [vmem:[#allocation7 + $0x90] ss:$24 sps:$4 sm:$0xff]   ;;  %v2225_v56 = vld [vmem:[#allocation7 + $0xa0] ss:$24 sps:$4 sm:$0xff]  }
 0x1af   :  { %978 = vmatprep.subr.bf16.mxu1 %v2131_v57  ;;  %1585 = vmatprep.subr.bf16.mxu0 %v2134_v58  ;;  %v2203_v57 = vld [vmem:[#allocation7 + $0xc4] ss:$24 sps:$4 sm:$0xff]   ;;  %v2233_v58 = vld [vmem:[#allocation7 + $0xd4] ss:$24 sps:$4 sm:$0xff]  }
 0x1b2   :  { %979 = vmatpush1.bf16.msra.mxu1 %v2129_v59  ;;  %1586 = vmatpush1.bf16.msra.mxu0 %v2132_v60  ;;  %v2201_v59 = vld [vmem:[#allocation7 + $0xc0] ss:$24 sps:$4 sm:$0xff]   ;;  %v2206_v60 = vld [vmem:[#allocation7 + $0xf4] ss:$24 sps:$4 sm:$0xff]  }
 0x1b3   :  { %980 = vmatprep.subr.bf16.mxu1 %v2137_v61  ;;  %1587 = vmatprep.subr.bf16.mxu0 %v2140_v62  ;;  %v2239_v61 = vld [vmem:[#allocation7 + $0x104] ss:$24 sps:$4 sm:$0xff]   ;;  %v2204_v62 = vld [vmem:[#allocation7 + $0xf0] ss:$24 sps:$4 sm:$0xff]  }
 0x1b6   :  { %981 = vmatpush1.bf16.msra.mxu1 %v2135_v63  ;;  %1588 = vmatpush1.bf16.msra.mxu0 %v2138_v0  ;;  %v2237_v63 = vld [vmem:[#allocation7 + $0x100] ss:$24 sps:$4 sm:$0xff]   ;;  %v2212_v0 = vld [vmem:[#allocation7 + $0x124] ss:$24 sps:$4 sm:$0xff]  }
 0x1b7   :  { %982 = vmatprep.subr.bf16.mxu1 %v2143_v1  ;;  %1589 = vmatprep.subr.bf16.mxu0 %v2146_v2  ;;  %v2245_v1 = vld [vmem:[#allocation7 + $0x134] ss:$24 sps:$4 sm:$0xff]   ;;  %v2210_v2 = vld [vmem:[#allocation7 + $0x120] ss:$24 sps:$4 sm:$0xff]  }
 0x1ba   :  { %983 = vmatpush1.bf16.msra.mxu1 %v2141_v3  ;;  %1590 = vmatpush1.bf16.msra.mxu0 %v2144_v4  ;;  %v2243_v3 = vld [vmem:[#allocation7 + $0x130] ss:$24 sps:$4 sm:$0xff]   ;;  %v2218_v4 = vld [vmem:[#allocation7 + $0x154] ss:$24 sps:$4 sm:$0xff]  }
 0x1bb   :  { %984 = vmatprep.subr.bf16.mxu1 %v2149_v5  ;;  %1591 = vmatprep.subr.bf16.mxu0 %v2152_v6  ;;  %v2251_v5 = vld [vmem:[#allocation7 + $0x164] ss:$24 sps:$4 sm:$0xff]   ;;  %v2216_v6 = vld [vmem:[#allocation7 + $0x150] ss:$24 sps:$4 sm:$0xff]  }
 0x1be   :  { %985 = vmatpush1.bf16.msra.mxu1 %v2147_v7  ;;  %1592 = vmatpush1.bf16.msra.mxu0 %v2150_v8  ;;  %v2249_v7 = vld [vmem:[#allocation7 + $0x160] ss:$24 sps:$4 sm:$0xff]   ;;  %v2224_v8 = vld [vmem:[#allocation7 + $0x184] ss:$24 sps:$4 sm:$0xff]  }
 0x1bf   :  { %986 = vmatprep.subr.bf16.mxu1 %v2155_v9  ;;  %1593 = vmatprep.subr.bf16.mxu0 %v2158_v10  ;;  %v2257_v9 = vld [vmem:[#allocation7 + $0x194] ss:$24 sps:$4 sm:$0xff]   ;;  %v2222_v10 = vld [vmem:[#allocation7 + $0x180] ss:$24 sps:$4 sm:$0xff]  }
 0x1c2   :  { %987 = vmatpush1.bf16.msra.mxu1 %v2153_v11  ;;  %1594 = vmatpush1.bf16.msra.mxu0 %v2156_v12  ;;  %v2255_v11 = vld [vmem:[#allocation7 + $0x190] ss:$24 sps:$4 sm:$0xff]   ;;  %v2230_v12 = vld [vmem:[#allocation7 + $0x1b4] ss:$24 sps:$4 sm:$0xff]  }
 0x1c3   :  { %988 = vmatprep.subr.bf16.mxu1 %v2161_v13  ;;  %1595 = vmatprep.subr.bf16.mxu0 %v2164_v14  ;;  %v2263_v13 = vld [vmem:[#allocation7 + $0x1c4] ss:$24 sps:$4 sm:$0xff]   ;;  %v2228_v14 = vld [vmem:[#allocation7 + $0x1b0] ss:$24 sps:$4 sm:$0xff]  }
 0x1c6   :  { %989 = vmatpush1.bf16.msra.mxu1 %v2159_v15  ;;  %1596 = vmatpush1.bf16.msra.mxu0 %v2162_v16  ;;  %v2261_v15 = vld [vmem:[#allocation7 + $0x1c0] ss:$24 sps:$4 sm:$0xff]   ;;  %v2236_v16 = vld [vmem:[#allocation7 + $0x1e4] ss:$24 sps:$4 sm:$0xff]  }
 0x1c7   :  { %990 = vmatprep.subr.bf16.mxu1 %v2167_v17  ;;  %1597 = vmatprep.subr.bf16.mxu0 %v2170_v18  ;;  %v2269_v17 = vld [vmem:[#allocation7 + $0x1f4] ss:$24 sps:$4 sm:$0xff]   ;;  %v2234_v18 = vld [vmem:[#allocation7 + $0x1e0] ss:$24 sps:$4 sm:$0xff]  }
 0x1ca   :  { %991 = vmatpush1.bf16.msra.mxu1 %v2165_v19  ;;  %1598 = vmatpush1.bf16.msra.mxu0 %v2168_v20  ;;  %v2267_v19 = vld [vmem:[#allocation7 + $0x1f0] ss:$24 sps:$4 sm:$0xff]   ;;  %v2242_v20 = vld [vmem:[#allocation7 + $0x214] ss:$24 sps:$4 sm:$0xff]  }
 0x1cb   :  { %992 = vmatprep.subr.bf16.mxu1 %v2173_v21  ;;  %1599 = vmatprep.subr.bf16.mxu0 %v2176_v24  ;;  %v2272_v21 = vld [vmem:[#allocation7 + $0x224] ss:$24 sps:$4 sm:$0xff]   ;;  %v2240_v24 = vld [vmem:[#allocation7 + $0x210] ss:$24 sps:$4 sm:$0xff]  }
 0x1ce   :  { %993 = vmatpush1.bf16.msra.mxu1 %v2171_v25  ;;  %1600 = vmatpush1.bf16.msra.mxu0 %v2174_v26  ;;  %v2270_v25 = vld [vmem:[#allocation7 + $0x220] ss:$24 sps:$4 sm:$0xff]   ;;  %v2248_v26 = vld [vmem:[#allocation7 + $0x244] ss:$24 sps:$4 sm:$0xff]  }
 0x1cf   :  { %994 = vmatprep.subr.bf16.mxu1 %v2179_v27  ;;  %1601 = vmatprep.subr.bf16.mxu0 %v2182_v28  ;;  %v2275_v27 = vld [vmem:[#allocation7 + $0x254] ss:$24 sps:$4 sm:$0xff]   ;;  %v2246_v28 = vld [vmem:[#allocation7 + $0x240] ss:$24 sps:$4 sm:$0xff]  }
 0x1d2   :  { %995 = vmatpush1.bf16.msra.mxu1 %v2177_v29  ;;  %1602 = vmatpush1.bf16.msra.mxu0 %v2180_v30  ;;  %v2273_v29 = vld [vmem:[#allocation7 + $0x250] ss:$24 sps:$4 sm:$0xff]   ;;  %v2254_v30 = vld [vmem:[#allocation7 + $0x274] ss:$24 sps:$4 sm:$0xff]  }
 0x1d3   :  { %996 = vmatprep.subr.bf16.mxu1 %v2185_v32  ;;  %1603 = vmatprep.subr.bf16.mxu0 %v2188_v33  ;;  %v2278_v32 = vld [vmem:[#allocation7 + $0x284] ss:$24 sps:$4 sm:$0xff]   ;;  %v2252_v33 = vld [vmem:[#allocation7 + $0x270] ss:$24 sps:$4 sm:$0xff]  }
 0x1d6   :  { %997 = vmatpush1.bf16.msra.mxu1 %v2183_v36  ;;  %1604 = vmatpush1.bf16.msra.mxu0 %v2186_v37  ;;  %v2260_v36 = vld [vmem:[#allocation7 + $0x2a4] ss:$24 sps:$4 sm:$0xff]   ;;  %v2281_v37 = vld [vmem:[#allocation7 + $0x2b4] ss:$24 sps:$4 sm:$0xff]  }
 0x1d7   :  { %1532 = vmatprep.subr.bf16.mxu1 %v2191_v38  ;;  %1614 = vmatprep.subr.bf16.mxu0 %v2209_v39  ;;  %v2258_v38 = vld [vmem:[#allocation7 + $0x2a0] ss:$24 sps:$4 sm:$0xff]   ;;  %v2279_v39 = vld [vmem:[#allocation7 + $0x2b0] ss:$24 sps:$4 sm:$0xff]  }
 0x1d9   :  { %999 = vmatmul.mubr.bf16.vlgmr.msra.gmra.mrb[4].mxu1 %v2488_v31  ;;  %1606 = vmatmul.mubr.bf16.vlgmr.msra.gmra.mrb[4].mxu0 %v2497_v40  ;;  %v2200_v31 = vld [vmem:[#allocation7 + $0x94] ss:$24 sps:$4 sm:$0xff]  }
 0x1da   :  { %1533 = vmatpush1.bf16.msra.mxu1 %v2189_v41  ;;  %1615 = vmatpush1.bf16.msra.mxu0 %v2207_v45  ;;  %v2266_v41 = vld [vmem:[#allocation7 + $0x2d4] ss:$24 sps:$4 sm:$0xff]   ;;  %v2284_v45 = vld [vmem:[#allocation7 + $0x2e4] ss:$24 sps:$4 sm:$0xff]  }
 0x1db   :  { %1534 = vmatprep.subr.bf16.mxu1 %v2194_v46  ;;  %1616 = vmatprep.subr.bf16.mxu0 %v2215_v47  ;;  %v2264_v46 = vld [vmem:[#allocation7 + $0x2d0] ss:$24 sps:$4 sm:$0xff]   ;;  %v2282_v47 = vld [vmem:[#allocation7 + $0x2e0] ss:$24 sps:$4 sm:$0xff]  }
 0x1dc   :  { %1564 = vmatprep.mubr.bf16.mxu1 %v2490_v35  ;;  %1646 = vmatprep.mubr.bf16.mxu0 %v2490_v35  ;;  %v2231_v35 = vld [vmem:[#allocation7 + $0xd0] ss:$24 sps:$4 sm:$0xff]  }
 0x1de   :  { %1535 = vmatpush1.bf16.msra.mxu1 %v2192_v48  ;;  %1617 = vmatpush1.bf16.msra.mxu0 %v2213_v49 }
 0x1df   :  { %1536 = vmatprep.subr.bf16.mxu1 %v2197_v50  ;;  %1618 = vmatprep.subr.bf16.mxu0 %v2221_v51 }
 0x1e2   :  { %1537 = vmatpush1.bf16.msra.mxu1 %v2195_v52  ;;  %1619 = vmatpush1.bf16.msra.mxu0 %v2219_v53 }
 0x1e3   :  { %1538 = vmatprep.subr.bf16.mxu1 %v2200_v31  ;;  %1620 = vmatprep.subr.bf16.mxu0 %v2227_v54 }
 0x1e6   :  { %1539 = vmatpush1.bf16.msra.mxu1 %v2198_v55  ;;  %1621 = vmatpush1.bf16.msra.mxu0 %v2225_v56  ;;  %v262_v55 = vld [vmem:[%s2531_s4] sm:$0x3f] }
 0x1e7   :  { %1540 = vmatprep.subr.bf16.mxu1 %v2203_v57  ;;  %1622 = vmatprep.subr.bf16.mxu0 %v2233_v58  ;;  %v263_v56 = vld [vmem:[%s2532_s5] sm:$0x3f]  ;;  %v857_v57 = vrot.slane %v262_v55, %v2474_v44  ;;  %v861_v58 = vrot.slane %v262_v55, %v2479_v22 }
 0x1ea   :  { %1541 = vmatpush1.bf16.msra.mxu1 %v2201_v59  ;;  %1623 = vmatpush1.bf16.msra.mxu0 %v2231_v35  ;;  %v1509_v59 = vrot.slane %v263_v56, %v2479_v22 }
 0x1eb   :  { %1542 = vmatprep.subr.bf16.mxu1 %v2206_v60  ;;  %1624 = vmatprep.subr.bf16.mxu0 %v2239_v61 }
 0x1ec   :  { %v1960_v60 = vadd.f32 %v1509_v59, %v861_v58 }
 0x1ee   :  { %1543 = vmatpush1.bf16.msra.mxu1 %v2204_v62  ;;  %1625 = vmatpush1.bf16.msra.mxu0 %v2237_v63 }
 0x1ef   :  { %1544 = vmatprep.subr.bf16.mxu1 %v2212_v0  ;;  %1626 = vmatprep.subr.bf16.mxu0 %v2245_v1 }
 0x1f2   :  { %1545 = vmatpush1.bf16.msra.mxu1 %v2210_v2  ;;  %1627 = vmatpush1.bf16.msra.mxu0 %v2243_v3 }
 0x1f3   :  { %1546 = vmatprep.subr.bf16.mxu1 %v2218_v4  ;;  %1628 = vmatprep.subr.bf16.mxu0 %v2251_v5 }
 0x1f6   :  { %1547 = vmatpush1.bf16.msra.mxu1 %v2216_v6  ;;  %1629 = vmatpush1.bf16.msra.mxu0 %v2249_v7 }
 0x1f7   :  { %1548 = vmatprep.subr.bf16.mxu1 %v2224_v8  ;;  %1630 = vmatprep.subr.bf16.mxu0 %v2257_v9  ;;  %v864_v9 = vsub.s32 2, %v2471_v43 }
 0x1fa   :  { %1549 = vmatpush1.bf16.msra.mxu1 %v2222_v10  ;;  %1631 = vmatpush1.bf16.msra.mxu0 %v2255_v11  ;;  %v868_v10 = vsub.s32 3, %v2471_v43  ;;  %v865_v11 = vrot.slane %v262_v55, %v864_v9 }
 0x1fb   :  { %1550 = vmatprep.subr.bf16.mxu1 %v2230_v12  ;;  %1632 = vmatprep.subr.bf16.mxu0 %v2263_v13  ;;  %v1513_v12 = vrot.slane %v263_v56, %v864_v9 }
 0x1fc   :  { %v869_v13 = vrot.slane %v262_v55, %v868_v10 }
 0x1fe   :  { %1551 = vmatpush1.bf16.msra.mxu1 %v2228_v14  ;;  %1633 = vmatpush1.bf16.msra.mxu0 %v2261_v15  ;;  %v1517_v14 = vrot.slane %v263_v56, %v868_v10  ;;  %v1962_v15 = vadd.f32 %v1513_v12, %v865_v11 }
 0x1ff   :  { %1552 = vmatprep.subr.bf16.mxu1 %v2236_v16  ;;  %1634 = vmatprep.subr.bf16.mxu0 %v2269_v17 }
 0x200   :  { %v1964_v17 = vadd.f32 %v1517_v14, %v869_v13 }
 0x202   :  { %1553 = vmatpush1.bf16.msra.mxu1 %v2234_v18  ;;  %1635 = vmatpush1.bf16.msra.mxu0 %v2267_v19 }
 0x203   :  { %1554 = vmatprep.subr.bf16.mxu1 %v2242_v20  ;;  %1636 = vmatprep.subr.bf16.mxu0 %v2272_v21 }
 0x206   :  { %1555 = vmatpush1.bf16.msra.mxu1 %v2240_v24  ;;  %1637 = vmatpush1.bf16.msra.mxu0 %v2270_v25  ;;  %v872_v24 = vsub.s32 4, %v2471_v43 }
 0x207   :  { %1556 = vmatprep.subr.bf16.mxu1 %v2248_v26  ;;  %1638 = vmatprep.subr.bf16.mxu0 %v2275_v27  ;;  %v876_v26 = vsub.s32 5, %v2471_v43 }
 0x208   :  { %v1521_v27 = vrot.slane %v263_v56, %v872_v24 }
 0x20a   :  { %1557 = vmatpush1.bf16.msra.mxu1 %v2246_v28  ;;  %1639 = vmatpush1.bf16.msra.mxu0 %v2273_v29  ;;  %v1525_v29 = vrot.slane %v263_v56, %v876_v26 }
 0x20b   :  { %1558 = vmatprep.subr.bf16.mxu1 %v2254_v30  ;;  %1640 = vmatprep.subr.bf16.mxu0 %v2278_v32  ;;  %v873_v32 = vrot.slane %v262_v55, %v872_v24 }
 0x20e   :  { %1559 = vmatpush1.bf16.msra.mxu1 %v2252_v33  ;;  %1641 = vmatpush1.bf16.msra.mxu0 %v2276_v34  ;;  %v877_v34 = vrot.slane %v262_v55, %v876_v26 }
 0x20f   :  { %1560 = vmatprep.subr.bf16.mxu1 %v2260_v36  ;;  %1642 = vmatprep.subr.bf16.mxu0 %v2281_v37 }
 0x212   :  { %1561 = vmatpush1.bf16.msra.mxu1 %v2258_v38  ;;  %1643 = vmatpush1.bf16.msra.mxu0 %v2279_v39 }
 0x213   :  { %1562 = vmatprep.subr.bf16.mxu1 %v2266_v41  ;;  %1644 = vmatprep.subr.bf16.mxu0 %v2284_v45 }
 0x216   :  { %1563 = vmatpush1.bf16.msra.mxu1 %v2264_v46  ;;  %1645 = vmatpush1.bf16.msra.mxu0 %v2282_v47 }
 0x219   :  { %1565 = vmatmul.mubr.bf16.vlgmr.msra.gmra.mrb[0].mxu1 %v2497_v40  ;;  %1647 = vmatmul.mubr.bf16.vlgmr.msra.gmra.mrb[8].mxu0 %v2497_v40  ;;  %v1505_v40 = vrot.slane %v263_v56, %v2474_v44 }
 0x21b   :  { %v1958_v35 = vadd.f32 %v1505_v40, %v857_v57 }
 0x2ac   :  { %v1000_v48 = vpop.f32.mrb[4].mxu1  ;;  %v1607_v49 = vpop.f32.mrb[4].mxu0 }
 0x2ad   :  { %v1002_v50 = vpop.f32.mrb[5].mxu1  ;;  %v1609_v51 = vpop.f32.mrb[5].mxu0  ;;  %v1963_v21 = vadd.f32 %v1962_v15, %v1607_v49  ;;  %v1001_v39 = vadd.f32 %v1000_v48, %v873_v32 }
 0x2ae   :  { %v1004_v52 = vpop.f32.mrb[6].mxu1  ;;  %v1611_v53 = vpop.f32.mrb[6].mxu0  ;;  %v1965_v25 = vadd.f32 %v1964_v17, %v1609_v51  ;;  %v1003_v45 = vadd.f32 %v1002_v50, %v877_v34  ;;  %v2384_v51 = vmov 1966171168  }
 0x2af   :  { %v1005_v31 = vpop.f32.mrb[7].mxu1  ;;  %v1612_v54 = vpop.f32.mrb[7].mxu0  ;;  %v1956_v28 = vmul.f32 -1.442695, %v1963_v21  ;;  %v1693_v52 = vunpack.c.l.s4 %v2384_v51 }
 0x2b0   :  { %v1957_v30 = vmul.f32 -1.442695, %v1965_v25 }
 0x2b1   :  { %v1694_v56 = vunpack.c.0.s8 %v1693_v52 }
 0x2b3   :  { %v1697_v40 = vsub.s32 %v1694_v56, %v2471_v43 }
 0x2ec   :  { %v1566_v61 = vpop.f32.mrb[0].mxu1  ;;  %v1648_v62 = vpop.f32.mrb[8].mxu0 }
 0x2ed   :  { %v1959_v63 = vadd.f32 %v1958_v35, %v1566_v61  ;;  %v1568_v0 = vpop.f32.mrb[1].mxu1  ;;  %v1650_v1 = vpop.f32.mrb[9].mxu0  ;;  %v1649_v33 = vadd.f32 %v1648_v62, %v1521_v27 }
 0x2ee   :  { %v1961_v2 = vadd.f32 %v1960_v60, %v1568_v0  ;;  %v1570_v3 = vpop.f32.mrb[2].mxu1  ;;  %v1652_v4 = vpop.f32.mrb[10].mxu0  ;;  %v1651_v36 = vadd.f32 %v1650_v1, %v1525_v29 }
 0x2ef   :  { %v1954_v5 = vmul.f32 -1.442695, %v1959_v63  ;;  %v1571_v6 = vpop.f32.mrb[3].mxu1  ;;  %v1653_v7 = vpop.f32.mrb[11].mxu0 }
 0x2f0   :  { %v1955_v8 = vmul.f32 -1.442695, %v1961_v2 }
 0x2f1   :  { %2285 = vpow2.f32 %v1954_v5 }
 0x2f2   :  { %2287 = vpow2.f32 %v1955_v8 }
 0x2fb   :  { %v2286_v16 = vpop.eup %2285 }
 0x2fc   :  { %v2288_v18 = vpop.eup %2287  ;;  %v1663_v19 = vadd.f32 1.0, %v2286_v16 }
 0x2fd   :  { %v1664_v20 = vadd.f32 1.0, %v2288_v18 }
 0x2fe   :  { %2289 = vrcp.f32 %v1663_v19 }
 0x2ff   :  { %2291 = vrcp.f32 %v1664_v20 }
 0x300   :  { %2293 = vpow2.f32 %v1956_v28 }
 0x301   :  { %2295 = vpow2.f32 %v1957_v30 }
 0x308   :  { %v2290_v37 = vpop.eup %2289 }
 0x309   :  { %v2292_v38 = vpop.eup %2291  ;;  %v1683_v41 = vmul.f32 %v2290_v37, %v1649_v33 }
 0x30a   :  { %v1684_v46 = vmul.f32 %v2292_v38, %v1651_v36  ;;  %v2294_v53 = vpop.eup %2293 }
 0x30b   :  { %v1685_v47 = vadd.f32 %v1683_v41, %v1001_v39  ;;  %v2296_v31 = vpop.eup %2295  ;;  %v1677_v54 = vadd.f32 1.0, %v2294_v53 }
 0x30c   :  { %v1686_v49 = vadd.f32 %v1684_v46, %v1003_v45  ;;  %v1678_v57 = vadd.f32 1.0, %v2296_v31 }
 0x30d   :  { %2297 = vtanh.f32 %v1685_v47 }
 0x30e   :  { %2299 = vtanh.f32 %v1686_v49 }
 0x30f   :  { %2301 = vrcp.f32 %v1677_v54 }
 0x310   :  { %2303 = vrcp.f32 %v1678_v57 }
 0x317   :  { %v2298_v55 = vpop.eup %2297 }
 0x318   :  { %v2300_v58 = vpop.eup %2299 }
 0x319   :  { %v1691_v48 = vcombine.low %v2298_v55, %v2300_v58  ;;  %v2302_v60 = vpop.eup %2301 }
 0x31a   :  { %v2304_v63 = vpop.eup %2303 }
 0x31b   :  { %v1698_v50 = vrot.slane %v1691_v48, %v1697_v40 }
 0x31d   :  { %v1705_v59 = vrot.slane %v1698_v50, %v1697_v40 }
 0x31f   :  { %v1707_v35 = vsub.f32 %v2484_v23, %v1705_v59 }
 0x321   :  { %v1712_v61 = vrot.slane %v1707_v35, %v2474_v44  ;;  %v1716_v62 = vrot.slane %v1707_v35, %v2479_v22 }
 0x323   :  { %v1719_v0 = vmul.f32 %v2302_v60, %v1712_v61  ;;  %v1720_v1 = vmul.f32 %v2304_v63, %v1716_v62 }
 0x325   :  { %v1721_v2 = vadd.f32 %v2298_v55, %v1719_v0  ;;  %v1722_v3 = vadd.f32 %v2300_v58, %v1720_v1 }
 0x327   :  { %v1725_v4 = vcombine.low %v1721_v2, %v1722_v3 }
 0x329   :  { %v1732_v5 = vrot.slane %v1725_v4, %v1697_v40 }
 0x32b   :  { %v1739_v43 = vrot.slane %v1732_v5, %v1697_v40 }
 0x32d   :  { %1745 = vst.msk [vmem:[%s2534_s7] sm:$0x3] %vm1743_vm2, %v1739_v43 }
 0x32e   :  { %1750 = vsyncpa [#allocation4], 1 }
 0x32f   :  { %1751 = vsyncpa [#allocation6], 1 }

</bundles_post_ra>
